<compile_context>
chip_gen: v5e
topology: v5e:2x2
jax: 0.10.0
libtpu: 0.0.40
codegen_flags: <defaults>
</compile_context>

<pallas_src>
import jax
import jax.numpy as jnp
from jax.experimental import pallas as pl
from jax.experimental.pallas import tpu as pltpu

ACTIONS = [794, 1000]
N_ACTIONS = len(ACTIONS)  # 2
IN_DIM = 2
HIDDEN = 64


def _round_up(n, m):
    return ((n + m - 1) // m) * m


def dqn_kernel(x_ref, w1_ref, b1_ref, w2_ref, b2_ref, w3_ref, b3_ref, out_ref):
    # Feature-major: x_ref is (IN_DIM, TILE_B); weights are PyTorch (out, in);
    # biases are (out, 1) column vectors that broadcast along the lane/batch axis.
    x = x_ref[...]                                   # (2, TILE_B)
    w1 = w1_ref[...]                                 # (64, 2)

    # fc1: contraction depth is only 2 -> two VPU broadcast FMAs, skip the MXU.
    h1 = w1[:, 0:1] * x[0:1, :] + w1[:, 1:2] * x[1:2, :] + b1_ref[...]
    h1 = jnp.maximum(h1, 0.0)                        # relu(fc1), (64, TILE_B)

    # fc2: (64, 64) @ (64, TILE_B) on the MXU with f32 accumulation.
    h2 = jnp.dot(w2_ref[...], h1, preferred_element_type=jnp.float32) + b2_ref[...]
    h2 = jnp.maximum(h2, 0.0)                        # relu(fc2), (64, TILE_B)

    # fc3: (2, 64) @ (64, TILE_B) -> (2, TILE_B); lane-dense output store.
    q = jnp.dot(w3_ref[...], h2, preferred_element_type=jnp.float32) + b3_ref[...]
    out_ref[...] = q.astype(out_ref.dtype)


def dqn_forward(x, params, tile_b=2048):
    """x: (B, IN_DIM) f32. Returns (B, N_ACTIONS) f32 (same as the PyTorch module)."""
    w1, b1, w2, b2, w3, b3 = params
    B = x.shape[0]

    # Batch tiles live on the lane axis -> multiples of 128. Clamp for tiny batches.
    tile_b = max(128, min(_round_up(tile_b, 128), _round_up(B, 128)))
    bp = _round_up(B, tile_b)

    # Layout plumbing outside the kernel: feature-major, zero-padded batch.
    x_fm = jnp.zeros((IN_DIM, bp), x.dtype).at[:, :B].set(x.T)

    grid = (bp // tile_b,)
    resident = lambda i: (0, 0)  # weights/biases: same block every step -> no re-DMA

    out_fm = pl.pallas_call(
        dqn_kernel,
        out_shape=jax.ShapeDtypeStruct((N_ACTIONS, bp), jnp.float32),
        grid=grid,
        in_specs=[
            pl.BlockSpec((IN_DIM, tile_b), lambda i: (0, i)),      # x tile (2, TILE_B)
            pl.BlockSpec((HIDDEN, IN_DIM), resident),              # w1 (64, 2)
            pl.BlockSpec((HIDDEN, 1), resident),                   # b1 (64, 1)
            pl.BlockSpec((HIDDEN, HIDDEN), resident),              # w2 (64, 64)
            pl.BlockSpec((HIDDEN, 1), resident),                   # b2 (64, 1)
            pl.BlockSpec((N_ACTIONS, HIDDEN), resident),           # w3 (2, 64)
            pl.BlockSpec((N_ACTIONS, 1), resident),                # b3 (2, 1)
        ],
        out_specs=pl.BlockSpec((N_ACTIONS, tile_b), lambda i: (0, i)),
        compiler_params=pltpu.CompilerParams(
            dimension_semantics=("parallel",),                     # megacore on v7x
        ),
    )(x_fm, w1, b1, w2, b2, w3, b3)

    return out_fm[:, :B].T  # back to batch-major (B, N_ACTIONS)


def init_params(key):
    """Deterministic synthetic init with native PyTorch nn.Linear layouts:
    weight (out_features, in_features), bias stored as (out_features, 1).
    Init mimics U(-1/sqrt(fan_in), 1/sqrt(fan_in))."""
    ks = jax.random.split(key, 6)

    def lin(kw, kb, fan_in, fan_out):
        bound = 1.0 / jnp.sqrt(jnp.float32(fan_in))
        w = jax.random.uniform(kw, (fan_out, fan_in), jnp.float32, -bound, bound)
        b = jax.random.uniform(kb, (fan_out, 1), jnp.float32, -bound, bound)
        return w, b

    w1, b1 = lin(ks[0], ks[1], IN_DIM, HIDDEN)
    w2, b2 = lin(ks[2], ks[3], HIDDEN, HIDDEN)
    w3, b3 = lin(ks[4], ks[5], HIDDEN, N_ACTIONS)
    return (w1, b1, w2, b2, w3, b3)


def reference_forward(x, params):
    w1, b1, w2, b2, w3, b3 = params
    h = jnp.maximum(x @ w1.T + b1[:, 0], 0.0)
    h = jnp.maximum(h @ w2.T + b2[:, 0], 0.0)
    return h @ w3.T + b3[:, 0]


if __name__ == "__main__":
    key = jax.random.PRNGKey(0)
    k_param, k_x = jax.random.split(key)

    params = init_params(k_param)
    batch = 8
    x = jax.random.normal(k_x, (batch, IN_DIM), dtype=jnp.float32)

    out = dqn_forward(x, params)
    out = jax.block_until_ready(out)

    ref = reference_forward(x, params)
    assert out.shape == (batch, N_ACTIONS)
    assert jnp.allclose(out, ref, atol=1e-5, rtol=1e-5)

    print("KERNEL_OK")
</pallas_src>

<mosaic_0001>
module attributes {stable_mosaic.version = 11 : i64} {
  func.func @dqn_kernel(%arg0: i32, %arg1: memref<2x128xf32, #tpu.memory_space<vmem>>, %arg2: memref<64x2xf32, #tpu.memory_space<vmem>>, %arg3: memref<64x1xf32, #tpu.memory_space<vmem>>, %arg4: memref<64x64xf32, #tpu.memory_space<vmem>>, %arg5: memref<64x1xf32, #tpu.memory_space<vmem>>, %arg6: memref<2x64xf32, #tpu.memory_space<vmem>>, %arg7: memref<2x1xf32, #tpu.memory_space<vmem>>, %arg8: memref<2x128xf32, #tpu.memory_space<vmem>>) attributes {dimension_semantics = [#tpu.dimension_semantics<parallel>], iteration_bounds = array<i64: 1>, scalar_prefetch = 0 : i64, scratch_operands = 0 : i64, tpu.core_type = #tpu.core_type<tc>, window_params = [{transform_indices = @transform_0, window_bounds = array<i64: 2, 128>}, {pipeline_mode = #tpu.pipeline_mode<synchronous>, transform_indices = @transform_1, window_bounds = array<i64: 64, 2>}, {pipeline_mode = #tpu.pipeline_mode<synchronous>, transform_indices = @transform_2, window_bounds = array<i64: 64, 1>}, {pipeline_mode = #tpu.pipeline_mode<synchronous>, transform_indices = @transform_3, window_bounds = array<i64: 64, 64>}, {pipeline_mode = #tpu.pipeline_mode<synchronous>, transform_indices = @transform_4, window_bounds = array<i64: 64, 1>}, {pipeline_mode = #tpu.pipeline_mode<synchronous>, transform_indices = @transform_5, window_bounds = array<i64: 2, 64>}, {pipeline_mode = #tpu.pipeline_mode<synchronous>, transform_indices = @transform_6, window_bounds = array<i64: 2, 1>}, {transform_indices = @transform_7, window_bounds = array<i64: 2, 128>}]} {
    %c0 = arith.constant 0 : index
    %c0_0 = arith.constant 0 : index
    %0 = vector.load %arg1[%c0, %c0_0] : memref<2x128xf32, #tpu.memory_space<vmem>>, vector<2x128xf32>
    %c0_1 = arith.constant 0 : index
    %c0_2 = arith.constant 0 : index
    %1 = vector.load %arg2[%c0_1, %c0_2] : memref<64x2xf32, #tpu.memory_space<vmem>>, vector<64x2xf32>
    %2 = vector.extract_strided_slice %1 {offsets = [0, 0], sizes = [64, 1], strides = [1, 1]} : vector<64x2xf32> to vector<64x1xf32>
    %3 = vector.extract_strided_slice %0 {offsets = [0, 0], sizes = [1, 128], strides = [1, 1]} : vector<2x128xf32> to vector<1x128xf32>
    %4 = vector.broadcast %2 : vector<64x1xf32> to vector<64x128xf32>
    %5 = vector.broadcast %3 : vector<1x128xf32> to vector<64x128xf32>
    %6 = arith.mulf %4, %5 : vector<64x128xf32>
    %7 = vector.extract_strided_slice %1 {offsets = [0, 1], sizes = [64, 1], strides = [1, 1]} : vector<64x2xf32> to vector<64x1xf32>
    %8 = vector.extract_strided_slice %0 {offsets = [1, 0], sizes = [1, 128], strides = [1, 1]} : vector<2x128xf32> to vector<1x128xf32>
    %9 = vector.broadcast %7 : vector<64x1xf32> to vector<64x128xf32>
    %10 = vector.broadcast %8 : vector<1x128xf32> to vector<64x128xf32>
    %11 = arith.mulf %9, %10 : vector<64x128xf32>
    %12 = arith.addf %6, %11 : vector<64x128xf32>
    %c0_3 = arith.constant 0 : index
    %c0_4 = arith.constant 0 : index
    %13 = vector.load %arg3[%c0_3, %c0_4] : memref<64x1xf32, #tpu.memory_space<vmem>>, vector<64x1xf32>
    %14 = vector.broadcast %13 : vector<64x1xf32> to vector<64x128xf32>
    %15 = arith.addf %12, %14 : vector<64x128xf32>
    %cst = arith.constant 0.000000e+00 : f32
    %16 = vector.broadcast %cst : f32 to vector<64x128xf32>
    %17 = arith.maximumf %15, %16 : vector<64x128xf32>
    %c0_5 = arith.constant 0 : index
    %c0_6 = arith.constant 0 : index
    %18 = vector.load %arg4[%c0_5, %c0_6] : memref<64x64xf32, #tpu.memory_space<vmem>>, vector<64x64xf32>
    %cst_7 = arith.constant dense<0.000000e+00> : vector<64x128xf32>
    %19 = tpu.matmul %18, %17, %cst_7 {dimension_numbers = #tpu.dot_dimension_numbers<[1], [0], [0], [1], [0, 0, 1, 1], [], []>} : vector<64x64xf32>, vector<64x128xf32>, vector<64x128xf32> -> vector<64x128xf32>
    %c0_8 = arith.constant 0 : index
    %c0_9 = arith.constant 0 : index
    %20 = vector.load %arg5[%c0_8, %c0_9] : memref<64x1xf32, #tpu.memory_space<vmem>>, vector<64x1xf32>
    %21 = vector.broadcast %20 : vector<64x1xf32> to vector<64x128xf32>
    %22 = arith.addf %19, %21 : vector<64x128xf32>
    %cst_10 = arith.constant 0.000000e+00 : f32
    %23 = vector.broadcast %cst_10 : f32 to vector<64x128xf32>
    %24 = arith.maximumf %22, %23 : vector<64x128xf32>
    %c0_11 = arith.constant 0 : index
    %c0_12 = arith.constant 0 : index
    %25 = vector.load %arg6[%c0_11, %c0_12] : memref<2x64xf32, #tpu.memory_space<vmem>>, vector<2x64xf32>
    %cst_13 = arith.constant dense<0.000000e+00> : vector<2x128xf32>
    %26 = tpu.matmul %25, %24, %cst_13 {dimension_numbers = #tpu.dot_dimension_numbers<[1], [0], [0], [1], [0, 0, 1, 1], [], []>} : vector<2x64xf32>, vector<64x128xf32>, vector<2x128xf32> -> vector<2x128xf32>
    %c0_14 = arith.constant 0 : index
    %c0_15 = arith.constant 0 : index
    %27 = vector.load %arg7[%c0_14, %c0_15] : memref<2x1xf32, #tpu.memory_space<vmem>>, vector<2x1xf32>
    %28 = vector.broadcast %27 : vector<2x1xf32> to vector<2x128xf32>
    %29 = arith.addf %26, %28 : vector<2x128xf32>
    %c0_16 = arith.constant 0 : index
    %c0_17 = arith.constant 0 : index
    %30 = vector.load %arg8[%c0_16, %c0_17] : memref<2x128xf32, #tpu.memory_space<vmem>>, vector<2x128xf32>
    tpu.vector_store %arg8[%c0_16, %c0_17], %29 {strides = array<i32>} : memref<2x128xf32, #tpu.memory_space<vmem>>, vector<2x128xf32>,
    return
  }
  func.func @transform_0(%arg0: i32) -> (i32, i32) {
    %c0_i32 = arith.constant 0 : i32
    %c0_i32_0 = arith.constant 0 : i32
    return %c0_i32, %arg0 : i32, i32
  }
  func.func @transform_1(%arg0: i32) -> (i32, i32) {
    %c0_i32 = arith.constant 0 : i32
    %c0_i32_0 = arith.constant 0 : i32
    %c0_i32_1 = arith.constant 0 : i32
    return %c0_i32, %c0_i32_0 : i32, i32
  }
  func.func @transform_2(%arg0: i32) -> (i32, i32) {
    %c0_i32 = arith.constant 0 : i32
    %c0_i32_0 = arith.constant 0 : i32
    %c0_i32_1 = arith.constant 0 : i32
    return %c0_i32, %c0_i32_0 : i32, i32
  }
  func.func @transform_3(%arg0: i32) -> (i32, i32) {
    %c0_i32 = arith.constant 0 : i32
    %c0_i32_0 = arith.constant 0 : i32
    %c0_i32_1 = arith.constant 0 : i32
    return %c0_i32, %c0_i32_0 : i32, i32
  }
  func.func @transform_4(%arg0: i32) -> (i32, i32) {
    %c0_i32 = arith.constant 0 : i32
    %c0_i32_0 = arith.constant 0 : i32
    %c0_i32_1 = arith.constant 0 : i32
    return %c0_i32, %c0_i32_0 : i32, i32
  }
  func.func @transform_5(%arg0: i32) -> (i32, i32) {
    %c0_i32 = arith.constant 0 : i32
    %c0_i32_0 = arith.constant 0 : i32
    %c0_i32_1 = arith.constant 0 : i32
    return %c0_i32, %c0_i32_0 : i32, i32
  }
  func.func @transform_6(%arg0: i32) -> (i32, i32) {
    %c0_i32 = arith.constant 0 : i32
    %c0_i32_0 = arith.constant 0 : i32
    %c0_i32_1 = arith.constant 0 : i32
    return %c0_i32, %c0_i32_0 : i32, i32
  }
  func.func @transform_7(%arg0: i32) -> (i32, i32) {
    %c0_i32 = arith.constant 0 : i32
    %c0_i32_0 = arith.constant 0 : i32
    return %c0_i32, %arg0 : i32, i32
  }
}

</mosaic_0001>

<bundles_post_ra>
// kernel: tpu_custom_call.1
= control target key start
LH: loop header
LB: loop body
LE: loop exit
PB: predicated region body
PF: predicated region fallthrough
CT: control target
= control target key end

     0   :  { %v438_v3 = vmov 0   ;;  %s598_s0 = inlined_call_operand.vmem [shape: f32[2,128], index: 0, kind: input, shape index: {}]   ;;  %s599_s1 = inlined_call_operand.vmem [shape: f32[64,2], index: 1, kind: input, shape index: {}]   ;;  %s600_s2 = inlined_call_operand.vmem [shape: f32[64,1], index: 2, kind: input, shape index: {}]   ;;  %s601_s3 = inlined_call_operand.vmem [shape: f32[64,64], index: 3, kind: input, shape index: {}]   ;;  %s602_s4 = inlined_call_operand.vmem [shape: f32[64,1], index: 4, kind: input, shape index: {}]   ;;  %s603_s5 = inlined_call_operand.vmem [shape: f32[2,64], index: 5, kind: input, shape index: {}]   ;;  %s604_s6 = inlined_call_operand.vmem [shape: f32[2,1], index: 6, kind: input, shape index: {}]   ;;  %s605_s7 = inlined_call_operand.hbm [shape: f32[2,128], index: 7, kind: output, shape index: {}]  }
   0x1   :  { %v35_v0 = vld [vmem:[%s599_s1 + $0x38] sm:$0xff]  ;;  %v34_v1 = vld [vmem:[%s599_s1 + $0x30] sm:$0xff]  ;;  %v33_v2 = vld [vmem:[%s599_s1 + $0x28] sm:$0xff]  ;;  %407 = vset.pattern.permute.xlu2 %v438_v3  ;;  %405 = vset.pattern.permute.xlu1 %v438_v3 }
   0x2   :  { %403 = vset.pattern.permute.xlu0 %v438_v3  ;;  %68 = vperm.xlu1 %405, %v34_v1  }
   0x3   :  { %12 = vsyncpa [#allocation3], 0  ;;  %73 = vperm.xlu0 %403, %v35_v0   ;;  %63 = vperm.xlu2 %407, %v33_v2   ;;  %v439_v4 = vmov 1   ;;  %v32_v5 = vld [vmem:[%s599_s1 + $0x20] sm:$0xff]  ;;  %v141_v6 = vld [vmem:[%s600_s2 + $0x38] sm:$0xff]  ;;  %vm254_vm0 = vcmask 523264  }
   0x4   :  { %v31_v7 = vld [vmem:[%s599_s1 + $0x18] sm:$0xff]  ;;  %v140_v8 = vld [vmem:[%s600_s2 + $0x30] sm:$0xff]  ;;  %v139_v10 = vld [vmem:[%s600_s2 + $0x28] sm:$0xff]  ;;  %s440_s17 = smov [#allocation2]   ;;  %s366_s21 = sshll.u32 %s605_s7, 4  ;;  %s367_s21 = int_to_ptr.hbm [resolvable:$true] %s366_s21 }
   0x5   :  { %v30_v9 = vld [vmem:[%s599_s1 + $0x10] sm:$0xff]  ;;  %v29_v11 = vld [vmem:[%s599_s1 + $0x8] sm:$0xff]  ;;  %v138_v12 = vld [vmem:[%s600_s2 + $0x20] sm:$0xff]  ;;  %s364_s18 = sshll.u32 %s440_s17, 4  ;;  %s365_s18 = int_to_ptr.vmem [resolvable:$true] %s364_s18 }
   0x6   :  { %v28_v13 = vld [vmem:[%s599_s1] sm:$0xff]  ;;  %v137_v14 = vld [vmem:[%s600_s2 + $0x18] sm:$0xff]  ;;  %v136_v15 = vld [vmem:[%s600_s2 + $0x10] sm:$0xff] }
   0x7   :  { %v134_v16 = vld [vmem:[%s600_s2] sm:$0xff]  ;;  %v135_v17 = vld [vmem:[%s600_s2 + $0x8] sm:$0xff]  ;;  %v213_v18 = vld [vmem:[%s602_s4 + $0x38] sm:$0xff] }
   0x8   :  { %v209_v19 = vld [vmem:[%s602_s4 + $0x18] sm:$0xff]  ;;  %v212_v20 = vld [vmem:[%s602_s4 + $0x30] sm:$0xff]  ;;  %v211_v21 = vld [vmem:[%s602_s4 + $0x28] sm:$0xff] }
   0x9   :  { %v206_v22 = vld [vmem:[%s602_s4] sm:$0xff]  ;;  %v208_v24 = vld [vmem:[%s602_s4 + $0x10] sm:$0xff]  ;;  %v207_v25 = vld [vmem:[%s602_s4 + $0x8] sm:$0xff] }
   0xa   :  { %406 = vset.pattern.permute.xlu1 %v439_v4  ;;  %v210_v23 = vld [vmem:[%s602_s4 + $0x20] sm:$0xff] }
   0xb   :  { %404 = vset.pattern.permute.xlu0 %v439_v4  ;;  %408 = vset.pattern.permute.xlu2 %v439_v4  ;;  %v329_v26 = vld [vmem:[%s604_s6] sm:$0x3] }
   0xc   :  { %114 = vperm.xlu0 %404, %v35_v0   ;;  %110 = vperm.xlu1 %406, %v34_v1   ;;  %v27_v34 = vld [vmem:[%s598_s0] sm:$0x3] }
   0xd   :  { %106 = vperm.xlu2 %408, %v33_v2   ;;  %v117_v35 = vperm.slane %v27_v34, 1  ;;  %v76_v36 = vperm.slane %v27_v34, 0  ;;  %v201_v34 = vld [vmem:[%s601_s3 + $0x18] sm:$0xff] }
  0x14   :  { %409 = vset.pattern.permute.xlu1 %v438_v3  ;;  %102 = vperm.xlu0 %404, %v32_v5  }
  0x15   :  { %410 = vset.pattern.permute.xlu2 %v438_v3  ;;  %179 = vperm.xlu1 %409, %v141_v6  }
  0x16   :  { %58 = vperm.xlu2 %410, %v32_v5  }
  0x1c   :  { %98 = vperm.xlu0 %404, %v31_v7  }
  0x1d   :  { %174 = vperm.xlu1 %409, %v140_v8  }
  0x1e   :  { %53 = vperm.xlu2 %410, %v31_v7  }
  0x24   :  { %94 = vperm.xlu0 %404, %v30_v9  }
  0x25   :  { %169 = vperm.xlu1 %409, %v139_v10  }
  0x26   :  { %48 = vperm.xlu2 %410, %v30_v9  }
  0x2c   :  { %90 = vperm.xlu0 %404, %v29_v11  }
  0x2d   :  { %164 = vperm.xlu1 %409, %v138_v12  }
  0x2e   :  { %43 = vperm.xlu2 %410, %v29_v11  }
  0x34   :  { %86 = vperm.xlu0 %404, %v28_v13  }
  0x35   :  { %159 = vperm.xlu1 %409, %v137_v14  }
  0x36   :  { %38 = vperm.xlu2 %410, %v28_v13  }
  0x3c   :  { %411 = vset.pattern.permute.xlu0 %v438_v3 }
  0x3d   :  { %154 = vperm.xlu1 %409, %v136_v15   ;;  %144 = vperm.xlu0 %411, %v134_v16  }
  0x3e   :  { %149 = vperm.xlu2 %410, %v135_v17  }
  0x45   :  { %251 = vperm.xlu1 %409, %v213_v18   ;;  %231 = vperm.xlu0 %411, %v209_v19  }
  0x46   :  { %246 = vperm.xlu2 %410, %v212_v20  }
  0x4d   :  { %241 = vperm.xlu1 %409, %v211_v21   ;;  %216 = vperm.xlu0 %411, %v206_v22  }
  0x4e   :  { %236 = vperm.xlu2 %410, %v210_v23  }
  0x55   :  { %226 = vperm.xlu1 %409, %v208_v24  }
  0x56   :  { %221 = vperm.xlu2 %410, %v207_v25  }
  0x5d   :  { %332 = vperm.xlu1 %409, %v329_v26   ;;  %v64_v27 = vpop.permute.xlu2 %63 }
  0x5e   :  { %v82_v52 = vmul.f32 %v76_v36, %v64_v27 }
  0x67   :  { %v107_v28 = vpop.permute.xlu2 %106 }
  0x68   :  { %v123_v53 = vmul.f32 %v117_v35, %v107_v28 }
  0x6a   :  { %v131_v56 = vadd.f32 %v123_v53, %v82_v52 }
  0x70   :  { %v59_v31 = vpop.permute.xlu2 %58 }
  0x71   :  { %v81_v59 = vmul.f32 %v76_v36, %v59_v31  ;;  %v200_v31 = vld [vmem:[%s601_s3 + $0x10] sm:$0xff] }
  0x74   :  { %v69_v29 = vpop.permute.xlu1 %68 }
  0x75   :  { %v74_v30 = vpop.permute.xlu0 %73  ;;  %v83_v46 = vmul.f32 %v76_v36, %v69_v29 }
  0x76   :  { %v84_v38 = vmul.f32 %v76_v36, %v74_v30  ;;  %v198_v30 = vld [vmem:[%s601_s3] sm:$0xff] }
  0x78   :  { %v54_v39 = vpop.permute.xlu2 %53 }
  0x79   :  { %v80_v5 = vmul.f32 %v76_v36, %v54_v39 }
  0x7e   :  { %v115_v32 = vpop.permute.xlu0 %114  ;;  %v111_v33 = vpop.permute.xlu1 %110 }
  0x7f   :  { %v125_v37 = vmul.f32 %v117_v35, %v115_v32  ;;  %v124_v44 = vmul.f32 %v117_v35, %v111_v33  ;;  %v203_v32 = vld [vmem:[%s601_s3 + $0x28] sm:$0xff] }
  0x80   :  { %v49_v50 = vpop.permute.xlu2 %48  ;;  %v199_v33 = vld [vmem:[%s601_s3 + $0x8] sm:$0xff] }
  0x81   :  { %v133_v41 = vadd.f32 %v125_v37, %v84_v38  ;;  %v132_v48 = vadd.f32 %v124_v44, %v83_v46  ;;  %v79_v15 = vmul.f32 %v76_v36, %v49_v50  ;;  %v205_v37 = vld [vmem:[%s601_s3 + $0x38] sm:$0xff] }
  0x86   :  { %v103_v40 = vpop.permute.xlu0 %102 }
  0x87   :  { %v180_v42 = vpop.permute.xlu1 %179  ;;  %v122_v60 = vmul.f32 %v117_v35, %v103_v40 }
  0x88   :  { %v189_v43 = vadd.f32 %v180_v42, %v133_v41  ;;  %v44_v61 = vpop.permute.xlu2 %43 }
  0x89   :  { %v130_v0 = vadd.f32 %v122_v60, %v81_v59  ;;  %v78_v12 = vmul.f32 %v76_v36, %v44_v61 }
  0x8a   :  { %v197_v45 = vmax.f32 %v189_v43, 0.0 }
  0x8c   :  { %287 = vmatpush.msra.mxu0 %v197_v45  ;;  %384 = vmatpush.msra.mxu2 %v197_v45 }
  0x8d   :  { %385 = vmatpush.msra.mxu3 %v197_v45 }
  0x8e   :  { %v99_v47 = vpop.permute.xlu0 %98 }
  0x8f   :  { %v175_v49 = vpop.permute.xlu1 %174  ;;  %v121_v3 = vmul.f32 %v117_v35, %v99_v47 }
  0x90   :  { %v188_v51 = vadd.f32 %v175_v49, %v132_v48  ;;  %v39_v6 = vpop.permute.xlu2 %38 }
  0x91   :  { %v129_v8 = vadd.f32 %v121_v3, %v80_v5  ;;  %v77_v18 = vmul.f32 %v76_v36, %v39_v6  ;;  %v202_v36 = vld [vmem:[%s601_s3 + $0x20] sm:$0xff] }
  0x92   :  { %v196_v54 = vmax.f32 %v188_v51, 0.0  ;;  %v328_v6 = vld [vmem:[%s603_s5] sm:$0x3] }
  0x94   :  { %288 = vmatpush.msra.mxu0 %v196_v54  ;;  %386 = vmatpush.msra.mxu2 %v196_v54 }
  0x95   :  { %387 = vmatpush.msra.mxu3 %v196_v54 }
  0x96   :  { %v95_v55 = vpop.permute.xlu0 %94 }
  0x97   :  { %v170_v57 = vpop.permute.xlu1 %169  ;;  %v120_v13 = vmul.f32 %v117_v35, %v95_v55 }
  0x98   :  { %v187_v58 = vadd.f32 %v170_v57, %v131_v56  ;;  %v150_v19 = vpop.permute.xlu2 %149 }
  0x99   :  { %v128_v20 = vadd.f32 %v120_v13, %v79_v15 }
  0x9a   :  { %v195_v62 = vmax.f32 %v187_v58, 0.0 }
  0x9c   :  { %289 = vmatpush.msra.mxu0 %v195_v62  ;;  %388 = vmatpush.msra.mxu2 %v195_v62 }
  0x9d   :  { %389 = vmatpush.msra.mxu3 %v195_v62 }
  0x9e   :  { %v91_v63 = vpop.permute.xlu0 %90 }
  0x9f   :  { %v165_v1 = vpop.permute.xlu1 %164  ;;  %v119_v10 = vmul.f32 %v117_v35, %v91_v63 }
  0xa0   :  { %v186_v2 = vadd.f32 %v165_v1, %v130_v0  ;;  %v247_v41 = vpop.permute.xlu2 %246 }
  0xa1   :  { %v127_v16 = vadd.f32 %v119_v10, %v78_v12 }
  0xa2   :  { %v194_v4 = vmax.f32 %v186_v2, 0.0 }
  0xa3   :  { %v183_v25 = vadd.f32 %v150_v19, %v127_v16 }
  0xa4   :  { %290 = vmatpush.msra.mxu0 %v194_v4  ;;  %390 = vmatpush.msra.mxu2 %v194_v4 }
  0xa5   :  { %391 = vmatpush.msra.mxu3 %v194_v4  ;;  %v191_v28 = vmax.f32 %v183_v25, 0.0 }
  0xa6   :  { %v87_v7 = vpop.permute.xlu0 %86 }
  0xa7   :  { %v160_v9 = vpop.permute.xlu1 %159  ;;  %v118_v17 = vmul.f32 %v117_v35, %v87_v7  ;;  %v204_v35 = vld [vmem:[%s601_s3 + $0x30] sm:$0xff] }
  0xa8   :  { %v185_v11 = vadd.f32 %v160_v9, %v129_v8  ;;  %v237_v46 = vpop.permute.xlu2 %236 }
  0xa9   :  { %v126_v24 = vadd.f32 %v118_v17, %v77_v18 }
  0xaa   :  { %v193_v14 = vmax.f32 %v185_v11, 0.0 }
  0xac   :  { %291 = vmatpush.msra.mxu0 %v193_v14  ;;  %392 = vmatpush.msra.mxu2 %v193_v14 }
  0xad   :  { %393 = vmatpush.msra.mxu3 %v193_v14 }
  0xaf   :  { %v155_v21 = vpop.permute.xlu1 %154  ;;  %v145_v22 = vpop.permute.xlu0 %144 }
  0xb0   :  { %v184_v23 = vadd.f32 %v155_v21, %v128_v20  ;;  %v182_v27 = vadd.f32 %v145_v22, %v126_v24  ;;  %v222_v62 = vpop.permute.xlu2 %221 }
  0xb2   :  { %v192_v26 = vmax.f32 %v184_v23, 0.0  ;;  %v190_v29 = vmax.f32 %v182_v27, 0.0 }
  0xb4   :  { %292 = vmatpush.msra.mxu0 %v192_v26  ;;  %394 = vmatpush.msra.mxu2 %v192_v26 }
  0xb5   :  { %395 = vmatpush.msra.mxu3 %v192_v26 }
  0xb6   :  { %293 = vmatpush.msra.mxu0 %v191_v28  ;;  %396 = vmatpush.msra.mxu2 %v191_v28 }
  0xb7   :  { %397 = vmatpush.msra.mxu3 %v191_v28  ;;  %v252_v40 = vpop.permute.xlu1 %251  ;;  %v232_v50 = vpop.permute.xlu0 %231 }
  0xb8   :  { %294 = vmatpush.msra.mxu0 %v190_v29  ;;  %398 = vmatpush.msra.mxu2 %v190_v29 }
  0xb9   :  { %399 = vmatpush.msra.mxu3 %v190_v29  ;;  %375 = vmatmul.msk.f32.vlgmr.msra.gmra.mxu0 %vm254_vm0, %v198_v30 }
  0xba   :  { %377 = vmatmul.msk.f32.vlgmr.msra.gmra.mxu2 %vm254_vm0, %v200_v31  ;;  %380 = vmatmul.msk.f32.vlgmr.msra.gmra.mxu3 %vm254_vm0, %v203_v32 }
  0xbf   :  { %v242_v44 = vpop.permute.xlu1 %241  ;;  %v217_v1 = vpop.permute.xlu0 %216 }
  0xc1   :  { %376 = vmatmul.msk.f32.gmra.mxu0 %vm254_vm0, %v199_v33 }
  0xc2   :  { %378 = vmatmul.msk.f32.gmra.mxu2 %vm254_vm0, %v201_v34  ;;  %381 = vmatmul.msk.f32.gmra.mxu3 %vm254_vm0, %v204_v35 }
  0xc7   :  { %v227_v58 = vpop.permute.xlu1 %226 }
  0xca   :  { %379 = vmatmul.msk.f32.gmra.mxu2 %vm254_vm0, %v202_v36  ;;  %382 = vmatmul.msk.f32.gmra.mxu3 %vm254_vm0, %v205_v37 }
  0xcf   :  { %v333_v7 = vpop.permute.xlu1 %332 }
 0x136   :  { %v296_v45 = vpop.f32.mrf.mxu0 }
 0x137   :  { %v297_v2 = vadd.f32 %v296_v45, %v217_v1 }
 0x139   :  { %v320_v5 = vmax.f32 %v297_v2, 0.0 }
 0x13d   :  { %v302_v38 = vpop.f32.mrf.mxu2  ;;  %v311_v39 = vpop.f32.mrf.mxu3 }
 0x13e   :  { %v312_v52 = vadd.f32 %v311_v39, %v242_v44  ;;  %v299_v59 = vpop.f32.mrf.mxu0  ;;  %v303_v60 = vadd.f32 %v302_v38, %v227_v58 }
 0x13f   :  { %v300_v63 = vadd.f32 %v299_v59, %v222_v62 }
 0x140   :  { %v325_v56 = vmax.f32 %v312_v52, 0.0  ;;  %v322_v3 = vmax.f32 %v303_v60, 0.0 }
 0x141   :  { %v321_v4 = vmax.f32 %v300_v63, 0.0 }
 0x145   :  { %v305_v42 = vpop.f32.mrf.mxu2  ;;  %v314_v43 = vpop.f32.mrf.mxu3 }
 0x146   :  { %v315_v48 = vadd.f32 %v314_v43, %v247_v41  ;;  %v306_v57 = vadd.f32 %v305_v42, %v232_v50 }
 0x148   :  { %v326_v54 = vmax.f32 %v315_v48, 0.0  ;;  %v323_v0 = vmax.f32 %v306_v57, 0.0 }
 0x14d   :  { %v317_v47 = vpop.f32.mrf.mxu3  ;;  %v308_v51 = vpop.f32.mrf.mxu2 }
 0x14e   :  { %v318_v49 = vadd.f32 %v317_v47, %v252_v40  ;;  %v309_v55 = vadd.f32 %v308_v51, %v237_v46 }
 0x150   :  { %v327_v53 = vmax.f32 %v318_v49, 0.0  ;;  %v324_v61 = vmax.f32 %v309_v55, 0.0 }
 0x152   :  { %346 = vmatpush.msra.mxu1 %v327_v53 }
 0x154   :  { %347 = vmatpush.msra.mxu1 %v326_v54 }
 0x156   :  { %348 = vmatpush.msra.mxu1 %v325_v56 }
 0x158   :  { %349 = vmatpush.msra.mxu1 %v324_v61 }
 0x15a   :  { %350 = vmatpush.msra.mxu1 %v323_v0 }
 0x15c   :  { %351 = vmatpush.msra.mxu1 %v322_v3 }
 0x15e   :  { %352 = vmatpush.msra.mxu1 %v321_v4 }
 0x160   :  { %353 = vmatpush.msra.mxu1 %v320_v5 }
 0x161   :  { %383 = vmatmul.msk.f32.vlgmr.msra.gmra.mxu1 %vm254_vm0, %v328_v6 }
 0x1de   :  { %v355_v8 = vpop.f32.mrf.mxu1 }
 0x1df   :  { %v356_v9 = vadd.f32 %v355_v8, %v333_v7 }
 0x1e1   :  { %358 = vst [vmem:[#allocation2] sm:$0x3] %v356_v9 }
 0x1e2   :  { %369 = dma.vmem_to_hbm [thread:$0]  %s365_s18, 32, %s367_s21, [#allocation3]  }
 0x1e3   :  { %436 = dma.done.wait [#allocation3], 32  }
 0x1e4   :  { %437 = vsyncadd [#allocation3], 4294967264 }
 0x1e5   :  { %374 = vsyncpa [#allocation3], 1 }

</bundles_post_ra>
